<compile_context>
chip_gen: v5e
topology: v5e:2x2
jax: 0.10.0
libtpu: 0.0.40
codegen_flags: <defaults>
</compile_context>

<pallas_src>
import functools
import math

import jax
import jax.numpy as jnp
from jax import lax
from jax.experimental import pallas as pl
from jax.experimental.pallas import tpu as pltpu

_LN_EPS = 1e-5  # torch.nn.LayerNorm default


def _layer_norm(x, eps=_LN_EPS):
    """LayerNorm over the last axis with gamma=1 / beta=0 (fresh nn.LayerNorm)."""
    mu = jnp.mean(x, axis=-1, keepdims=True)
    xc = x - mu
    var = jnp.mean(xc * xc, axis=-1, keepdims=True)
    return xc * lax.rsqrt(var + eps)


def _decoder_layer_kernel(dec_ref, enc_ref, wq_ref, wk_ref, wv_ref, wfc_ref,
                          w1_ref, w2_ref, out_ref, attn_ref,
                          *, n_heads, d_k, d_v, tb, lq, lk, mxu_dtype):
    H, dk, dv = n_heads, d_k, d_v
    f32 = jnp.float32
    cast = (lambda a: a.astype(mxu_dtype)) if mxu_dtype is not None else (lambda a: a)

    x2 = dec_ref[...]                      # (TB*Lq, d_model)  residual
    e2 = enc_ref[...]                      # (TB*Lk, d_model)

    # Wide single-dispatch QKV projections (all heads fused along the lane dim),
    # operands in input / mxu dtype, f32 accumulation.  1/sqrt(d_k) is already
    # folded into wq (parameter prep).
    q = jnp.dot(cast(x2), wq_ref[...], preferred_element_type=f32)    # (TB*Lq, H*dk)
    k = jnp.dot(cast(e2), wk_ref[...], preferred_element_type=f32)    # (TB*Lk, H*dk)
    v = jnp.dot(cast(e2), wv_ref[...], preferred_element_type=f32)    # (TB*Lk, H*dv)

    # Regroup head-major: (g, len, d) with g = h*TB + b.  Only static lane
    # slices, leading-dim reshapes and axis-0 concat (no minor-dim reshapes /
    # value transposes inside the kernel).
    def heads_to_batch(t, length, d):
        parts = [t[:, h * d:(h + 1) * d].reshape(tb, length, d) for h in range(H)]
        return jnp.concatenate(parts, axis=0)                         # (H*TB, len, d)

    qg = heads_to_batch(q, lq, dk)                                    # (G, Lq, dk)
    kg = heads_to_batch(k, lk, dk)                                    # (G, Lk, dk)
    vg = heads_to_batch(v, lk, dv)                                    # (G, Lk, dv)

    # Scores + softmax for ALL heads and batch rows at once (single exp pass,
    # single exact divide -> stored attn rows sum to 1).
    s = jnp.einsum('gqd,gkd->gqk', cast(qg), cast(kg),
                   preferred_element_type=f32)                        # (G, Lq, Lk)
    m = jnp.max(s, axis=-1, keepdims=True)
    ex = jnp.exp(s - m)
    p = ex / jnp.sum(ex, axis=-1, keepdims=True)

    # One slab store for the attention output (no per-head masked stores).
    attn_ref[...] = p.reshape(H, tb, lq, lk).astype(attn_ref.dtype)

    # Context for all heads in one batched matmul; merge heads back onto lanes
    # in registers (no VMEM scratch round trip).
    ctxg = jnp.einsum('gqk,gkd->gqd', cast(p), cast(vg),
                      preferred_element_type=f32)                     # (G, Lq, dv)
    ctx2 = jnp.concatenate(
        [ctxg[h * tb:(h + 1) * tb].reshape(tb * lq, dv) for h in range(H)],
        axis=-1)                                                      # (TB*Lq, H*dv)

    # Output projection + residual + LayerNorm (f32 elementwise math).
    mha = jnp.dot(cast(ctx2), wfc_ref[...], preferred_element_type=f32)
    y = _layer_norm(mha + x2.astype(f32))                             # (TB*Lq, d_model)

    # Position-wise FFN (Linear -> ReLU -> Linear) + residual + LayerNorm.
    h1 = jnp.maximum(
        jnp.dot(cast(y), w1_ref[...], preferred_element_type=f32), 0.0)
    h2 = jnp.dot(cast(h1), w2_ref[...], preferred_element_type=f32)
    out_ref[...] = _layer_norm(h2 + y).astype(out_ref.dtype)


def prepare_params(params, d_k, mxu_dtype=None):
    """One-time parameter prep: fold 1/sqrt(d_k) into W_Q, optional bf16 cast."""
    out = dict(params)
    out["w_q"] = params["w_q"] * (1.0 / math.sqrt(d_k))
    if mxu_dtype is not None:
        out = {name: w.astype(mxu_dtype) for name, w in out.items()}
    return out


def decoder_layer(dec_inputs, enc_outputs, prepped, *, n_heads, d_k, d_v,
                  batch_blocks=1, mxu_dtype=None):
    """Pallas DecoderLayer.forward.

    dec_inputs:  [B, len_q, d_model];  enc_outputs: [B, len_k, d_model]
    prepped: output of prepare_params (w_q already scaled by 1/sqrt(d_k)).
    batch_blocks: grid steps over the batch.  1 is optimal on v5e/v6e (single
      TensorCore); on v7x use 2 so each TC gets one fat "parallel" step.
    Returns (dec_outputs [B, len_q, d_model], attn [B, H, len_q, len_k]).
    """
    B, Lq, d_model = dec_inputs.shape
    _, Lk, _ = enc_outputs.shape
    H = n_heads
    assert B % batch_blocks == 0, "batch_blocks must divide the batch size"
    TB = B // batch_blocks

    w_q, w_k, w_v = prepped["w_q"], prepped["w_k"], prepped["w_v"]
    w_fc, w1, w2 = prepped["w_fc"], prepped["w1"], prepped["w2"]
    d_ff = w1.shape[1]

    # Flatten activations to 2-D slabs so every grid step feeds TB*L rows into
    # the MXU and every output is one contiguous store.
    dec2 = dec_inputs.reshape(B * Lq, d_model)
    enc2 = enc_outputs.reshape(B * Lk, d_model)

    def full2d(w):  # whole weight matrix resident in VMEM, reused across grid
        return pl.BlockSpec(w.shape, lambda i: (0, 0))

    in_specs = [
        pl.BlockSpec((TB * Lq, d_model), lambda i: (i, 0)),
        pl.BlockSpec((TB * Lk, d_model), lambda i: (i, 0)),
        full2d(w_q), full2d(w_k), full2d(w_v), full2d(w_fc), full2d(w1), full2d(w2),
    ]
    out_specs = [
        pl.BlockSpec((TB * Lq, d_model), lambda i: (i, 0)),
        pl.BlockSpec((H, TB, Lq, Lk), lambda i: (0, i, 0, 0)),
    ]
    out_shapes = (
        jax.ShapeDtypeStruct((B * Lq, d_model), dec_inputs.dtype),
        jax.ShapeDtypeStruct((H, B, Lq, Lk), jnp.float32),
    )

    flops = 2 * (
        B * Lq * d_model * H * d_k        # Q proj
        + B * Lk * d_model * H * d_k      # K proj
        + B * Lk * d_model * H * d_v      # V proj
        + B * H * Lq * Lk * d_k           # scores
        + B * H * Lq * Lk * d_v           # context
        + B * Lq * H * d_v * d_model      # fc
        + B * Lq * d_model * d_ff         # ffn 1
        + B * Lq * d_ff * d_model         # ffn 2
    )
    bytes_accessed = sum(a.size * a.dtype.itemsize
                         for a in (dec2, enc2, w_q, w_k, w_v, w_fc, w1, w2))
    bytes_accessed += (B * Lq * d_model) * dec_inputs.dtype.itemsize
    bytes_accessed += (H * B * Lq * Lk) * 4
    cost = pl.CostEstimate(flops=int(flops),
                           transcendentals=int(B * H * Lq * Lk + 2 * B * Lq),
                           bytes_accessed=int(bytes_accessed))

    kernel = functools.partial(_decoder_layer_kernel, n_heads=H, d_k=d_k, d_v=d_v,
                               tb=TB, lq=Lq, lk=Lk, mxu_dtype=mxu_dtype)

    dec_out2, attn_hb = pl.pallas_call(
        kernel,
        out_shape=out_shapes,
        grid_spec=pltpu.PrefetchScalarGridSpec(
            num_scalar_prefetch=0,
            grid=(batch_blocks,),
            in_specs=in_specs,
            out_specs=out_specs,
        ),
        compiler_params=pltpu.CompilerParams(
            dimension_semantics=("parallel",),
            vmem_limit_bytes=32 * 1024 * 1024,
        ),
        cost_estimate=cost,
    )(dec2, enc2, w_q, w_k, w_v, w_fc, w1, w2)

    dec_out = dec_out2.reshape(B, Lq, d_model)
    attn = jnp.transpose(attn_hb, (1, 0, 2, 3))   # (B, H, Lq, Lk), outside kernel
    return dec_out, attn


def _reference(dec_inputs, enc_outputs, params, *, n_heads, d_k, d_v):
    """Pure-JAX replica of the PyTorch DecoderLayer forward (raw params)."""
    B, Lq, _ = dec_inputs.shape
    Lk = enc_outputs.shape[1]
    Q = (dec_inputs @ params["w_q"]).reshape(B, Lq, n_heads, d_k).transpose(0, 2, 1, 3)
    K = (enc_outputs @ params["w_k"]).reshape(B, Lk, n_heads, d_k).transpose(0, 2, 1, 3)
    V = (enc_outputs @ params["w_v"]).reshape(B, Lk, n_heads, d_v).transpose(0, 2, 1, 3)
    scores = jnp.einsum("bhqd,bhkd->bhqk", Q, K) / jnp.sqrt(jnp.float32(d_k))
    attn = jax.nn.softmax(scores, axis=-1)
    ctx = jnp.einsum("bhqk,bhkd->bhqd", attn, V)
    ctx = ctx.transpose(0, 2, 1, 3).reshape(B, Lq, n_heads * d_v)
    y = _layer_norm(ctx @ params["w_fc"] + dec_inputs)
    ffn = jnp.maximum(y @ params["w1"], 0.0) @ params["w2"]
    return _layer_norm(ffn + y), attn


if __name__ == "__main__":
    # Small shapes consistent with the module (decoder query length = 1).
    B, len_q, len_k = 2, 1, 8
    d_model, d_ff, d_k, d_v, n_heads = 32, 64, 8, 8, 4

    key = jax.random.PRNGKey(0)
    keys = jax.random.split(key, 8)
    dec_inputs = jax.random.normal(keys[0], (B, len_q, d_model), jnp.float32)
    enc_outputs = jax.random.normal(keys[1], (B, len_k, d_model), jnp.float32)
    scale = 0.1
    params = {
        "w_q": scale * jax.random.normal(keys[2], (d_model, n_heads * d_k), jnp.float32),
        "w_k": scale * jax.random.normal(keys[3], (d_model, n_heads * d_k), jnp.float32),
        "w_v": scale * jax.random.normal(keys[4], (d_model, n_heads * d_v), jnp.float32),
        "w_fc": scale * jax.random.normal(keys[5], (n_heads * d_v, d_model), jnp.float32),
        "w1": scale * jax.random.normal(keys[6], (d_model, d_ff), jnp.float32),
        "w2": scale * jax.random.normal(keys[7], (d_ff, d_model), jnp.float32),
    }

    # One-time parameter prep (folds 1/sqrt(d_k) into W_Q).  Pass
    # mxu_dtype=jnp.bfloat16 here and below for bf16 MXU operands on v6e/v7x.
    prepped = prepare_params(params, d_k, mxu_dtype=None)

    dec_out, attn = decoder_layer(dec_inputs, enc_outputs, prepped,
                                  n_heads=n_heads, d_k=d_k, d_v=d_v,
                                  batch_blocks=1, mxu_dtype=None)
    jax.block_until_ready((dec_out, attn))

    ref_out, ref_attn = _reference(dec_inputs, enc_outputs, params,
                                   n_heads=n_heads, d_k=d_k, d_v=d_v)
    assert jnp.allclose(attn, ref_attn, atol=1e-4, rtol=1e-4), "attn mismatch"
    assert jnp.allclose(dec_out, ref_out, atol=1e-4, rtol=1e-4), "dec_out mismatch"

    print("KERNEL_OK")
</pallas_src>

<mosaic_0001>
module attributes {stable_mosaic.version = 11 : i64} {
  func.func @_decoder_layer_kernel(%arg0: i32, %arg1: memref<2x32xf32, #tpu.memory_space<vmem>>, %arg2: memref<16x32xf32, #tpu.memory_space<vmem>>, %arg3: memref<32x32xf32, #tpu.memory_space<vmem>>, %arg4: memref<32x32xf32, #tpu.memory_space<vmem>>, %arg5: memref<32x32xf32, #tpu.memory_space<vmem>>, %arg6: memref<32x32xf32, #tpu.memory_space<vmem>>, %arg7: memref<32x64xf32, #tpu.memory_space<vmem>>, %arg8: memref<64x32xf32, #tpu.memory_space<vmem>>, %arg9: memref<2x32xf32, #tpu.memory_space<vmem>>, %arg10: memref<4x2x1x8xf32, #tpu.memory_space<vmem>>) attributes {dimension_semantics = [#tpu.dimension_semantics<parallel>], iteration_bounds = array<i64: 1>, scalar_prefetch = 0 : i64, scratch_operands = 0 : i64, tpu.core_type = #tpu.core_type<tc>, window_params = [{transform_indices = @transform_0, window_bounds = array<i64: 2, 32>}, {transform_indices = @transform_1, window_bounds = array<i64: 16, 32>}, {pipeline_mode = #tpu.pipeline_mode<synchronous>, transform_indices = @transform_2, window_bounds = array<i64: 32, 32>}, {pipeline_mode = #tpu.pipeline_mode<synchronous>, transform_indices = @transform_3, window_bounds = array<i64: 32, 32>}, {pipeline_mode = #tpu.pipeline_mode<synchronous>, transform_indices = @transform_4, window_bounds = array<i64: 32, 32>}, {pipeline_mode = #tpu.pipeline_mode<synchronous>, transform_indices = @transform_5, window_bounds = array<i64: 32, 32>}, {pipeline_mode = #tpu.pipeline_mode<synchronous>, transform_indices = @transform_6, window_bounds = array<i64: 32, 64>}, {pipeline_mode = #tpu.pipeline_mode<synchronous>, transform_indices = @transform_7, window_bounds = array<i64: 64, 32>}, {transform_indices = @transform_8, window_bounds = array<i64: 2, 32>}, {transform_indices = @transform_9, window_bounds = array<i64: 4, 2, 1, 8>}]} {
    %c0 = arith.constant 0 : index
    %c0_0 = arith.constant 0 : index
    %0 = vector.load %arg1[%c0, %c0_0] : memref<2x32xf32, #tpu.memory_space<vmem>>, vector<2x32xf32>
    %c0_1 = arith.constant 0 : index
    %c0_2 = arith.constant 0 : index
    %1 = vector.load %arg2[%c0_1, %c0_2] : memref<16x32xf32, #tpu.memory_space<vmem>>, vector<16x32xf32>
    %c0_3 = arith.constant 0 : index
    %c0_4 = arith.constant 0 : index
    %2 = vector.load %arg3[%c0_3, %c0_4] : memref<32x32xf32, #tpu.memory_space<vmem>>, vector<32x32xf32>
    %cst = arith.constant dense<0.000000e+00> : vector<2x32xf32>
    %3 = tpu.matmul %0, %2, %cst {dimension_numbers = #tpu.dot_dimension_numbers<[1], [0], [0], [1], [0, 0, 1, 1], [], []>} : vector<2x32xf32>, vector<32x32xf32>, vector<2x32xf32> -> vector<2x32xf32>
    %c0_5 = arith.constant 0 : index
    %c0_6 = arith.constant 0 : index
    %4 = vector.load %arg4[%c0_5, %c0_6] : memref<32x32xf32, #tpu.memory_space<vmem>>, vector<32x32xf32>
    %cst_7 = arith.constant dense<0.000000e+00> : vector<16x32xf32>
    %5 = tpu.matmul %1, %4, %cst_7 {dimension_numbers = #tpu.dot_dimension_numbers<[1], [0], [0], [1], [0, 0, 1, 1], [], []>} : vector<16x32xf32>, vector<32x32xf32>, vector<16x32xf32> -> vector<16x32xf32>
    %c0_8 = arith.constant 0 : index
    %c0_9 = arith.constant 0 : index
    %6 = vector.load %arg5[%c0_8, %c0_9] : memref<32x32xf32, #tpu.memory_space<vmem>>, vector<32x32xf32>
    %cst_10 = arith.constant dense<0.000000e+00> : vector<16x32xf32>
    %7 = tpu.matmul %1, %6, %cst_10 {dimension_numbers = #tpu.dot_dimension_numbers<[1], [0], [0], [1], [0, 0, 1, 1], [], []>} : vector<16x32xf32>, vector<32x32xf32>, vector<16x32xf32> -> vector<16x32xf32>
    %8 = vector.extract_strided_slice %3 {offsets = [0, 0], sizes = [2, 8], strides = [1, 1]} : vector<2x32xf32> to vector<2x8xf32>
    %9 = vector.shape_cast %8 : vector<2x8xf32> to vector<2x1x8xf32>
    %10 = vector.extract_strided_slice %3 {offsets = [0, 8], sizes = [2, 8], strides = [1, 1]} : vector<2x32xf32> to vector<2x8xf32>
    %11 = vector.shape_cast %10 : vector<2x8xf32> to vector<2x1x8xf32>
    %12 = vector.extract_strided_slice %3 {offsets = [0, 16], sizes = [2, 8], strides = [1, 1]} : vector<2x32xf32> to vector<2x8xf32>
    %13 = vector.shape_cast %12 : vector<2x8xf32> to vector<2x1x8xf32>
    %14 = vector.extract_strided_slice %3 {offsets = [0, 24], sizes = [2, 8], strides = [1, 1]} : vector<2x32xf32> to vector<2x8xf32>
    %15 = vector.shape_cast %14 : vector<2x8xf32> to vector<2x1x8xf32>
    %16 = tpu.concatenate %9, %11, %13, %15 in 0 : vector<2x1x8xf32>, vector<2x1x8xf32>, vector<2x1x8xf32>, vector<2x1x8xf32> -> vector<8x1x8xf32>
    %17 = vector.extract_strided_slice %5 {offsets = [0, 0], sizes = [16, 8], strides = [1, 1]} : vector<16x32xf32> to vector<16x8xf32>
    %18 = vector.shape_cast %17 : vector<16x8xf32> to vector<2x8x8xf32>
    %19 = vector.extract_strided_slice %5 {offsets = [0, 8], sizes = [16, 8], strides = [1, 1]} : vector<16x32xf32> to vector<16x8xf32>
    %20 = vector.shape_cast %19 : vector<16x8xf32> to vector<2x8x8xf32>
    %21 = vector.extract_strided_slice %5 {offsets = [0, 16], sizes = [16, 8], strides = [1, 1]} : vector<16x32xf32> to vector<16x8xf32>
    %22 = vector.shape_cast %21 : vector<16x8xf32> to vector<2x8x8xf32>
    %23 = vector.extract_strided_slice %5 {offsets = [0, 24], sizes = [16, 8], strides = [1, 1]} : vector<16x32xf32> to vector<16x8xf32>
    %24 = vector.shape_cast %23 : vector<16x8xf32> to vector<2x8x8xf32>
    %25 = tpu.concatenate %18, %20, %22, %24 in 0 : vector<2x8x8xf32>, vector<2x8x8xf32>, vector<2x8x8xf32>, vector<2x8x8xf32> -> vector<8x8x8xf32>
    %26 = vector.extract_strided_slice %7 {offsets = [0, 0], sizes = [16, 8], strides = [1, 1]} : vector<16x32xf32> to vector<16x8xf32>
    %27 = vector.shape_cast %26 : vector<16x8xf32> to vector<2x8x8xf32>
    %28 = vector.extract_strided_slice %7 {offsets = [0, 8], sizes = [16, 8], strides = [1, 1]} : vector<16x32xf32> to vector<16x8xf32>
    %29 = vector.shape_cast %28 : vector<16x8xf32> to vector<2x8x8xf32>
    %30 = vector.extract_strided_slice %7 {offsets = [0, 16], sizes = [16, 8], strides = [1, 1]} : vector<16x32xf32> to vector<16x8xf32>
    %31 = vector.shape_cast %30 : vector<16x8xf32> to vector<2x8x8xf32>
    %32 = vector.extract_strided_slice %7 {offsets = [0, 24], sizes = [16, 8], strides = [1, 1]} : vector<16x32xf32> to vector<16x8xf32>
    %33 = vector.shape_cast %32 : vector<16x8xf32> to vector<2x8x8xf32>
    %34 = tpu.concatenate %27, %29, %31, %33 in 0 : vector<2x8x8xf32>, vector<2x8x8xf32>, vector<2x8x8xf32>, vector<2x8x8xf32> -> vector<8x8x8xf32>
    "tpu.trace_start"() <{level = 10 : i32, message = "gqd,gkd->gqk"}> : () -> ()
    %cst_11 = arith.constant dense<0.000000e+00> : vector<8x1x8xf32>
    %35 = tpu.matmul %16, %25, %cst_11 {dimension_numbers = #tpu.dot_dimension_numbers<[2], [2], [1], [1], [0, 0, 0, 1, 1, 1], [0], [0]>} : vector<8x1x8xf32>, vector<8x8x8xf32>, vector<8x1x8xf32> -> vector<8x1x8xf32>
    "tpu.trace_stop"() : () -> ()
    %cst_12 = arith.constant dense<0xFF800000> : vector<8x1xf32>
    %36 = vector.multi_reduction <maximumf>, %35, %cst_12 [2] : vector<8x1x8xf32> to vector<8x1xf32>
    %37 = vector.shape_cast %36 : vector<8x1xf32> to vector<8x1x1xf32>
    %38 = vector.broadcast %37 : vector<8x1x1xf32> to vector<8x1x8xf32>
    %39 = arith.subf %35, %38 : vector<8x1x8xf32>
    %40 = math.exp %39 : vector<8x1x8xf32>
    %cst_13 = arith.constant dense<0.000000e+00> : vector<8x1xf32>
    %41 = vector.multi_reduction <add>, %40, %cst_13 [2] : vector<8x1x8xf32> to vector<8x1xf32>
    %42 = vector.shape_cast %41 : vector<8x1xf32> to vector<8x1x1xf32>
    %43 = vector.broadcast %42 : vector<8x1x1xf32> to vector<8x1x8xf32>
    %44 = arith.divf %40, %43 : vector<8x1x8xf32>
    %45 = vector.shape_cast %44 : vector<8x1x8xf32> to vector<4x2x1x8xf32>
    %c0_14 = arith.constant 0 : index
    %c0_15 = arith.constant 0 : index
    %c0_16 = arith.constant 0 : index
    %c0_17 = arith.constant 0 : index
    %46 = vector.load %arg10[%c0_14, %c0_15, %c0_16, %c0_17] : memref<4x2x1x8xf32, #tpu.memory_space<vmem>>, vector<4x2x1x8xf32>
    tpu.vector_store %arg10[%c0_14, %c0_15, %c0_16, %c0_17], %45 {strides = array<i32>} : memref<4x2x1x8xf32, #tpu.memory_space<vmem>>, vector<4x2x1x8xf32>,
    "tpu.trace_start"() <{level = 10 : i32, message = "gqk,gkd->gqd"}> : () -> ()
    %cst_18 = arith.constant dense<0.000000e+00> : vector<8x1x8xf32>
    %47 = tpu.matmul %44, %34, %cst_18 {dimension_numbers = #tpu.dot_dimension_numbers<[2], [1], [1], [2], [0, 0, 0, 1, 1, 2], [0], [0]>} : vector<8x1x8xf32>, vector<8x8x8xf32>, vector<8x1x8xf32> -> vector<8x1x8xf32>
    "tpu.trace_stop"() : () -> ()
    %48 = vector.extract_strided_slice %47 {offsets = [0, 0, 0], sizes = [2, 1, 8], strides = [1, 1, 1]} : vector<8x1x8xf32> to vector<2x1x8xf32>
    %49 = vector.shape_cast %48 : vector<2x1x8xf32> to vector<2x8xf32>
    %50 = vector.extract_strided_slice %47 {offsets = [2, 0, 0], sizes = [2, 1, 8], strides = [1, 1, 1]} : vector<8x1x8xf32> to vector<2x1x8xf32>
    %51 = vector.shape_cast %50 : vector<2x1x8xf32> to vector<2x8xf32>
    %52 = vector.extract_strided_slice %47 {offsets = [4, 0, 0], sizes = [2, 1, 8], strides = [1, 1, 1]} : vector<8x1x8xf32> to vector<2x1x8xf32>
    %53 = vector.shape_cast %52 : vector<2x1x8xf32> to vector<2x8xf32>
    %54 = vector.extract_strided_slice %47 {offsets = [6, 0, 0], sizes = [2, 1, 8], strides = [1, 1, 1]} : vector<8x1x8xf32> to vector<2x1x8xf32>
    %55 = vector.shape_cast %54 : vector<2x1x8xf32> to vector<2x8xf32>
    %56 = tpu.concatenate %49, %51, %53, %55 in 1 : vector<2x8xf32>, vector<2x8xf32>, vector<2x8xf32>, vector<2x8xf32> -> vector<2x32xf32>
    %c0_19 = arith.constant 0 : index
    %c0_20 = arith.constant 0 : index
    %57 = vector.load %arg6[%c0_19, %c0_20] : memref<32x32xf32, #tpu.memory_space<vmem>>, vector<32x32xf32>
    %cst_21 = arith.constant dense<0.000000e+00> : vector<2x32xf32>
    %58 = tpu.matmul %56, %57, %cst_21 {dimension_numbers = #tpu.dot_dimension_numbers<[1], [0], [0], [1], [0, 0, 1, 1], [], []>} : vector<2x32xf32>, vector<32x32xf32>, vector<2x32xf32> -> vector<2x32xf32>
    %59 = arith.addf %58, %0 : vector<2x32xf32>
    %cst_22 = arith.constant dense<0.000000e+00> : vector<2xf32>
    %60 = vector.multi_reduction <add>, %59, %cst_22 [1] : vector<2x32xf32> to vector<2xf32>
    %61 = vector.shape_cast %60 : vector<2xf32> to vector<2x1xf32>
    %cst_23 = arith.constant 3.200000e+01 : f32
    %62 = vector.broadcast %cst_23 : f32 to vector<2x1xf32>
    %63 = arith.divf %61, %62 : vector<2x1xf32>
    %64 = vector.broadcast %63 : vector<2x1xf32> to vector<2x32xf32>
    %65 = arith.subf %59, %64 : vector<2x32xf32>
    %66 = arith.mulf %65, %65 : vector<2x32xf32>
    %cst_24 = arith.constant dense<0.000000e+00> : vector<2xf32>
    %67 = vector.multi_reduction <add>, %66, %cst_24 [1] : vector<2x32xf32> to vector<2xf32>
    %68 = vector.shape_cast %67 : vector<2xf32> to vector<2x1xf32>
    %cst_25 = arith.constant 3.200000e+01 : f32
    %69 = vector.broadcast %cst_25 : f32 to vector<2x1xf32>
    %70 = arith.divf %68, %69 : vector<2x1xf32>
    %cst_26 = arith.constant 9.99999974E-6 : f32
    %71 = vector.broadcast %cst_26 : f32 to vector<2x1xf32>
    %72 = arith.addf %70, %71 : vector<2x1xf32>
    %73 = math.rsqrt %72 : vector<2x1xf32>
    %74 = vector.broadcast %73 : vector<2x1xf32> to vector<2x32xf32>
    %75 = arith.mulf %65, %74 : vector<2x32xf32>
    %c0_27 = arith.constant 0 : index
    %c0_28 = arith.constant 0 : index
    %76 = vector.load %arg7[%c0_27, %c0_28] : memref<32x64xf32, #tpu.memory_space<vmem>>, vector<32x64xf32>
    %cst_29 = arith.constant dense<0.000000e+00> : vector<2x64xf32>
    %77 = tpu.matmul %75, %76, %cst_29 {dimension_numbers = #tpu.dot_dimension_numbers<[1], [0], [0], [1], [0, 0, 1, 1], [], []>} : vector<2x32xf32>, vector<32x64xf32>, vector<2x64xf32> -> vector<2x64xf32>
    %cst_30 = arith.constant 0.000000e+00 : f32
    %78 = vector.broadcast %cst_30 : f32 to vector<2x64xf32>
    %79 = arith.maximumf %77, %78 : vector<2x64xf32>
    %c0_31 = arith.constant 0 : index
    %c0_32 = arith.constant 0 : index
    %80 = vector.load %arg8[%c0_31, %c0_32] : memref<64x32xf32, #tpu.memory_space<vmem>>, vector<64x32xf32>
    %cst_33 = arith.constant dense<0.000000e+00> : vector<2x32xf32>
    %81 = tpu.matmul %79, %80, %cst_33 {dimension_numbers = #tpu.dot_dimension_numbers<[1], [0], [0], [1], [0, 0, 1, 1], [], []>} : vector<2x64xf32>, vector<64x32xf32>, vector<2x32xf32> -> vector<2x32xf32>
    %82 = arith.addf %81, %75 : vector<2x32xf32>
    %cst_34 = arith.constant dense<0.000000e+00> : vector<2xf32>
    %83 = vector.multi_reduction <add>, %82, %cst_34 [1] : vector<2x32xf32> to vector<2xf32>
    %84 = vector.shape_cast %83 : vector<2xf32> to vector<2x1xf32>
    %cst_35 = arith.constant 3.200000e+01 : f32
    %85 = vector.broadcast %cst_35 : f32 to vector<2x1xf32>
    %86 = arith.divf %84, %85 : vector<2x1xf32>
    %87 = vector.broadcast %86 : vector<2x1xf32> to vector<2x32xf32>
    %88 = arith.subf %82, %87 : vector<2x32xf32>
    %89 = arith.mulf %88, %88 : vector<2x32xf32>
    %cst_36 = arith.constant dense<0.000000e+00> : vector<2xf32>
    %90 = vector.multi_reduction <add>, %89, %cst_36 [1] : vector<2x32xf32> to vector<2xf32>
    %91 = vector.shape_cast %90 : vector<2xf32> to vector<2x1xf32>
    %cst_37 = arith.constant 3.200000e+01 : f32
    %92 = vector.broadcast %cst_37 : f32 to vector<2x1xf32>
    %93 = arith.divf %91, %92 : vector<2x1xf32>
    %cst_38 = arith.constant 9.99999974E-6 : f32
    %94 = vector.broadcast %cst_38 : f32 to vector<2x1xf32>
    %95 = arith.addf %93, %94 : vector<2x1xf32>
    %96 = math.rsqrt %95 : vector<2x1xf32>
    %97 = vector.broadcast %96 : vector<2x1xf32> to vector<2x32xf32>
    %98 = arith.mulf %88, %97 : vector<2x32xf32>
    %c0_39 = arith.constant 0 : index
    %c0_40 = arith.constant 0 : index
    %99 = vector.load %arg9[%c0_39, %c0_40] : memref<2x32xf32, #tpu.memory_space<vmem>>, vector<2x32xf32>
    tpu.vector_store %arg9[%c0_39, %c0_40], %98 {strides = array<i32>} : memref<2x32xf32, #tpu.memory_space<vmem>>, vector<2x32xf32>,
    return
  }
  func.func @transform_0(%arg0: i32) -> (i32, i32) {
    %c0_i32 = arith.constant 0 : i32
    %c0_i32_0 = arith.constant 0 : i32
    return %arg0, %c0_i32 : i32, i32
  }
  func.func @transform_1(%arg0: i32) -> (i32, i32) {
    %c0_i32 = arith.constant 0 : i32
    %c0_i32_0 = arith.constant 0 : i32
    return %arg0, %c0_i32 : i32, i32
  }
  func.func @transform_2(%arg0: i32) -> (i32, i32) {
    %c0_i32 = arith.constant 0 : i32
    %c0_i32_0 = arith.constant 0 : i32
    %c0_i32_1 = arith.constant 0 : i32
    return %c0_i32, %c0_i32_0 : i32, i32
  }
  func.func @transform_3(%arg0: i32) -> (i32, i32) {
    %c0_i32 = arith.constant 0 : i32
    %c0_i32_0 = arith.constant 0 : i32
    %c0_i32_1 = arith.constant 0 : i32
    return %c0_i32, %c0_i32_0 : i32, i32
  }
  func.func @transform_4(%arg0: i32) -> (i32, i32) {
    %c0_i32 = arith.constant 0 : i32
    %c0_i32_0 = arith.constant 0 : i32
    %c0_i32_1 = arith.constant 0 : i32
    return %c0_i32, %c0_i32_0 : i32, i32
  }
  func.func @transform_5(%arg0: i32) -> (i32, i32) {
    %c0_i32 = arith.constant 0 : i32
    %c0_i32_0 = arith.constant 0 : i32
    %c0_i32_1 = arith.constant 0 : i32
    return %c0_i32, %c0_i32_0 : i32, i32
  }
  func.func @transform_6(%arg0: i32) -> (i32, i32) {
    %c0_i32 = arith.constant 0 : i32
    %c0_i32_0 = arith.constant 0 : i32
    %c0_i32_1 = arith.constant 0 : i32
    return %c0_i32, %c0_i32_0 : i32, i32
  }
  func.func @transform_7(%arg0: i32) -> (i32, i32) {
    %c0_i32 = arith.constant 0 : i32
    %c0_i32_0 = arith.constant 0 : i32
    %c0_i32_1 = arith.constant 0 : i32
    return %c0_i32, %c0_i32_0 : i32, i32
  }
  func.func @transform_8(%arg0: i32) -> (i32, i32) {
    %c0_i32 = arith.constant 0 : i32
    %c0_i32_0 = arith.constant 0 : i32
    return %arg0, %c0_i32 : i32, i32
  }
  func.func @transform_9(%arg0: i32) -> (i32, i32, i32, i32) {
    %c0_i32 = arith.constant 0 : i32
    %c0_i32_0 = arith.constant 0 : i32
    %c0_i32_1 = arith.constant 0 : i32
    %c0_i32_2 = arith.constant 0 : i32
    return %c0_i32, %arg0, %c0_i32_0, %c0_i32_1 : i32, i32, i32, i32
  }
}

</mosaic_0001>

<bundles_post_ra>
// kernel: tpu_custom_call.1
= control target key start
LH: loop header
LB: loop body
LE: loop exit
PB: predicated region body
PF: predicated region fallthrough
CT: control target
= control target key end

     0   :  { %15 = vsyncpa [#allocation3], 0  ;;  %s1562_s0 = inlined_call_operand.hbm [shape: f32[2,32], index: 0, kind: input, shape index: {}]   ;;  %s1563_s1 = inlined_call_operand.hbm [shape: f32[16,32], index: 1, kind: input, shape index: {}]   ;;  %s1564_s2 = inlined_call_operand.vmem [shape: f32[32,32], index: 2, kind: input, shape index: {}]   ;;  %s1565_s3 = inlined_call_operand.vmem [shape: f32[32,32], index: 3, kind: input, shape index: {}]   ;;  %s1566_s4 = inlined_call_operand.vmem [shape: f32[32,32], index: 4, kind: input, shape index: {}]   ;;  %s1567_s5 = inlined_call_operand.hbm [shape: f32[32,32], index: 5, kind: input, shape index: {}]   ;;  %s1568_s6 = inlined_call_operand.hbm [shape: f32[32,64], index: 6, kind: input, shape index: {}]   ;;  %s1569_s7 = inlined_call_operand.vmem [shape: f32[64,32], index: 7, kind: input, shape index: {}]   ;;  %s1570_s8 = inlined_call_operand.hbm [shape: f32[2,32], index: 8, kind: output, shape index: {0}]   ;;  %s1571_s9 = inlined_call_operand.hbm [shape: f32[4,2,1,8], index: 9, kind: output, shape index: {1}]  }
   0x1   :  { %16 = vsyncpa [#allocation6], 0 }
   0x2   :  { %17 = vsyncpa [#allocation9], 0 }
   0x3   :  { %18 = vsyncpa [#allocation4], 0  ;;  %s35_s11 = sshll.u32 %s1563_s1, 4  ;;  %s36_s11 = int_to_ptr.hbm [resolvable:$true] %s35_s11 }
   0x4   :  { %19 = vsyncpa [#allocation12], 0  ;;  %s1274_s12 = smov [#allocation5]   ;;  %s25_s16 = sshll.u32 %s1562_s0, 4  ;;  %s26_s16 = int_to_ptr.hbm [resolvable:$true] %s25_s16 }
   0x5   :  { %s37_s13 = sshll.u32 %s1274_s12, 4  ;;  %s1275_s17 = smov 128   ;;  %s38_s13 = int_to_ptr.vmem [resolvable:$true] %s37_s13 }
   0x6   :  { %s1276_s18 = smov 8   ;;  %s1277_s19 = smov [#allocation2]  }
   0x7   :  { %43 = dma.hbm_to_vmem [thread:$0]  %s36_s11, 256, %s38_s13, [#allocation6], %s1275_s17, %s1275_s17, %s1276_s18  }
   0x8   :  { %s27_s20 = sshll.u32 %s1277_s19, 4  ;;  %s54_s1 = sshll.u32 %s1567_s5, 4  ;;  %s28_s20 = int_to_ptr.vmem [resolvable:$true] %s27_s20  ;;  %s55_s1 = int_to_ptr.hbm [resolvable:$true] %s54_s1 }
   0x9   :  { %30 = dma.hbm_to_vmem [thread:$0]  %s26_s16, 32, %s28_s20, [#allocation3]  }
   0xa   :  { %s67_s25 = sshll.u32 %s1568_s6, 4  ;;  %s1278_s26 = smov [#allocation7]   ;;  %s68_s25 = int_to_ptr.hbm [resolvable:$true] %s67_s25 }
   0xb   :  { %s56_s0 = sshll.u32 %s1278_s26, 4  ;;  %s1279_s27 = smov [#allocation8]   ;;  %s57_s0 = int_to_ptr.vmem [resolvable:$true] %s56_s0 }
   0xc   :  { %62 = dma.hbm_to_vmem [thread:$0]  %s55_s1, 512, %s57_s0, [#allocation6], %s1275_s17, %s1275_s17, %s1276_s18  }
   0xd   :  { %s69_s28 = sshll.u32 %s1279_s27, 4  ;;  %s70_s28 = int_to_ptr.vmem [resolvable:$true] %s69_s28 }
   0xe   :  { %75 = dma.hbm_to_vmem [thread:$0]  %s68_s25, 512, %s70_s28, [#allocation9], %s1275_s17, %s1275_s17, %s1276_s18  }
   0xf   :  { %1264 = dma.done.wait [#allocation3], 32  }
  0x10   :  { %1265 = vsyncadd [#allocation3], 4294967264 }
  0x11   :  { %1266 = dma.done.wait [#allocation6], 768  }
  0x12   :  { %1267 = vsyncadd [#allocation6], 4294966528 }
  0x13   :  { %1268 = dma.done.wait [#allocation9], 512  }
  0x14   :  { %1269 = vsyncadd [#allocation9], 4294966784  ;;  %v128_v0 = vld [vmem:[%s1565_s3 + $0x18] sm:$0xff]  ;;  %v127_v1 = vld [vmem:[%s1565_s3 + $0x10] sm:$0xff]  ;;  %vm101_vm0 = vcmask 261120   ;;  %vm233_vm1 = vcmask 64512  }
  0x15   :  { %v100_v2 = vld [vmem:[%s1564_s2 + $0x18] sm:$0xff]  ;;  %147 = vmatpush.msra.mxu1 %v128_v0  ;;  %v99_v3 = vld [vmem:[%s1564_s2 + $0x10] sm:$0xff]  ;;  %v126_v4 = vld [vmem:[%s1565_s3 + $0x8] sm:$0xff]  ;;  %s1282_s1 = smov 112   ;;  %vm426_vm2 = vcmask 57344   ;;  %s1284_s29 = smov 24  }
  0x16   :  { %117 = vmatpush.msra.mxu0 %v100_v2  ;;  %v98_v5 = vld [vmem:[%s1564_s2 + $0x8] sm:$0xff]  ;;  %v125_v6 = vld [vmem:[%s1565_s3] sm:$0xff]  ;;  %s1281_s3 = smov 104   ;;  %v161_v31 = vld [vmem:[%s1566_s4 + $0x18] sm:$0xff]  ;;  %s1000_s24 = sshll.u32 %s1571_s9, 4  ;;  %s1001_s24 = int_to_ptr.hbm [resolvable:$true] %s1000_s24 }
  0x17   :  { %148 = vmatpush.msra.mxu1 %v127_v1  ;;  %v97_v7 = vld [vmem:[%s1564_s2] sm:$0xff]  ;;  %v1386_v10 = vld [vmem:[#allocation5 + $0x8] sm:$0xff]  ;;  %s1280_s2 = smov 120   ;;  %174 = vmatpush.msra.mxu2 %v161_v31  ;;  %s1287_s25 = smov 1  }
  0x18   :  { %118 = vmatpush.msra.mxu0 %v99_v3  ;;  %v1378_v8 = vld [vmem:[#allocation5] sm:$0xff]  ;;  %v1380_v9 = vld [vmem:[#allocation2] sm:$0x3]  ;;  %v160_v32 = vld [vmem:[%s1566_s4 + $0x10] sm:$0xff]  ;;  %s1288_s9 = smov [#allocation10]   ;;  %s990_s28 = sshll.u32 %s1570_s8, 4  ;;  %s991_s28 = int_to_ptr.hbm [resolvable:$true] %s990_s28 }
  0x19   :  { %149 = vmatpush.msra.mxu1 %v126_v4  ;;  %v159_v33 = vld [vmem:[%s1566_s4 + $0x8] sm:$0xff]  ;;  %175 = vmatpush.msra.mxu2 %v160_v32  ;;  %v158_v34 = vld [vmem:[%s1566_s4] sm:$0xff]  ;;  %s1283_s4 = smov 16   ;;  %s988_s26 = sshll.u32 %s1288_s9, 4  ;;  %s989_s26 = int_to_ptr.vmem [resolvable:$true] %s988_s26 }
  0x1a   :  { %119 = vmatpush.msra.mxu0 %v98_v5 }
  0x1b   :  { %150 = vmatpush.msra.mxu1 %v125_v6  ;;  %176 = vmatpush.msra.mxu2 %v159_v33 }
  0x1c   :  { %120 = vmatpush.msra.mxu0 %v97_v7  ;;  %1021 = vmatmul.msk.f32.vlgmr.msra.gmra.mxu1 %vm101_vm0, %v1378_v8 }
  0x1d   :  { %1020 = vmatmul.msk.f32.vlgmr.msra.gmra.mxu0 %vm101_vm0, %v1380_v9  ;;  %177 = vmatpush.msra.mxu2 %v158_v34 }
  0x1e   :  { %1023 = vmatmul.msk.f32.vlgmr.msra.gmra.mxu2 %vm101_vm0, %v1378_v8 }
  0x24   :  { %1022 = vmatmul.msk.f32.gmra.mxu1 %vm101_vm0, %v1386_v10 }
  0x26   :  { %1024 = vmatmul.msk.f32.gmra.mxu2 %vm101_vm0, %v1386_v10 }
  0x99   :  { %v152_v11 = vpop.f32.mrf.mxu1 }
  0x9a   :  { %201 = vrot.lane.b32.xlu2 %v152_v11, %s1280_s2  ;;  %209 = vrot.lane.b32.xlu1 %v152_v11, %s1281_s3  ;;  %v122_v12 = vpop.f32.mrf.mxu0 }
  0x9b   :  { %1025 = vmatpush.xpose.msk.msra.mxu3 %vm233_vm1, %v152_v11  ;;  %v186_v14 = vrot.slane %v122_v12, 1 }
  0x9e   :  { %1026 = vmatmul.msk.f32.vlgmr.msra.gmra.mxu3 %vm233_vm1, %v122_v12 }
  0xa1   :  { %v155_v13 = vpop.f32.mrf.mxu1  ;;  %v1450_v57 = vpop.f32.mrf.mxu2 }
  0xa2   :  { %211 = vrot.lane.b32.xlu2 %v155_v13, %s1281_s3  ;;  %203 = vrot.lane.b32.xlu0 %v155_v13, %s1280_s2 }
  0xa3   :  { %1027 = vmatpush.xpose.msk.msrb.mxu3 %vm233_vm1, %v155_v13  ;;  %195 = vrot.lane.b32.xlu1 %v122_v12, %s1281_s3 }
  0xa6   :  { %1028 = vmatmul.msk.f32.vlgmr.msrb.gmra.mxu3 %vm233_vm1, %v186_v14 }
  0xa9   :  { %v182_v2 = vpop.f32.mrf.mxu2 }
  0xaa   :  { %207 = vrot.lane.b32.xlu2 %v155_v13, %s1282_s1  ;;  %189 = vrot.lane.b32.xlu0 %v186_v14, %s1280_s2 }
  0xab   :  { %197 = vrot.lane.b32.xlu1 %v186_v14, %s1281_s3 }
  0xb2   :  { %191 = vrot.lane.b32.xlu2 %v122_v12, %s1282_s1  ;;  %187 = vrot.lane.b32.xlu0 %v122_v12, %s1280_s2 }
  0xb3   :  { %193 = vrot.lane.b32.xlu1 %v186_v14, %s1282_s1 }
  0xba   :  { %205 = vrot.lane.b32.xlu0 %v152_v11, %s1282_s1 }
  0xf4   :  { %v202_v15 = vpop.permute.xlu2 %201 }
  0xf5   :  { %1029 = vmatpush.xpose.msk.msrb.mxu0 %vm233_vm1, %v202_v15 }
  0xfc   :  { %v212_v16 = vpop.permute.xlu2 %211 }
 0x104   :  { %v208_v17 = vpop.permute.xlu2 %207 }
 0x105   :  { %1035 = vmatpush.xpose.msk.msrb.mxu1 %vm233_vm1, %v208_v17 }
 0x109   :  { %668 = vmatpush.msra.mxu1 %v182_v2 }
 0x10c   :  { %v210_v18 = vpop.permute.xlu1 %209  ;;  %v192_v30 = vpop.permute.xlu2 %191 }
 0x114   :  { %v204_v19 = vpop.permute.xlu0 %203 }
 0x115   :  { %v196_v20 = vpop.permute.xlu1 %195  ;;  %1031 = vmatpush.xpose.msk.msra.mxu3 %vm233_vm1, %v204_v19 }
 0x119   :  { %1037 = vmatpush.xpose.msk.msrb.mxu3 %vm233_vm1, %v210_v18 }
 0x11c   :  { %v190_v21 = vpop.permute.xlu0 %189 }
 0x11d   :  { %v198_v22 = vpop.permute.xlu1 %197  ;;  %1032 = vmatmul.msk.f32.vlgmr.msra.gmra.mxu3 %vm233_vm1, %v190_v21 }
 0x11e   :  { %1039 = vmatpush.xpose.msk.msra.mxu3 %vm233_vm1, %v212_v16 }
 0x121   :  { %v255_v23 = vpop.f32.mrf.mxu3 }
 0x122   :  { %v427_v24 = vsel %vm426_vm2, %v255_v23, -inf }
 0x123   :  { %428 = vmax.xlane.f32.xlu2 %v427_v24 }
 0x124   :  { %v188_v25 = vpop.permute.xlu0 %187 }
 0x125   :  { %v194_v26 = vpop.permute.xlu1 %193  ;;  %1030 = vmatmul.msk.f32.vlgmr.msrb.gmra.mxu0 %vm233_vm1, %v188_v25  ;;  %1038 = vmatmul.msk.f32.vlgmr.msrb.gmra.mxu3 %vm233_vm1, %v196_v20 }
 0x126   :  { %1036 = vmatmul.msk.f32.vlgmr.msrb.gmra.mxu1 %vm233_vm1, %v194_v26 }
 0x129   :  { %v279_v27 = vpop.f32.mrf.mxu3 }
 0x12a   :  { %v430_v28 = vsel %vm426_vm2, %v279_v27, -inf }
 0x12b   :  { %431 = vmax.xlane.f32.xlu2 %v430_v28 }
 0x12c   :  { %v206_v29 = vpop.permute.xlu0 %205 }
 0x12d   :  { %1033 = vmatpush.xpose.msk.msra.mxu0 %vm233_vm1, %v206_v29  ;;  %1040 = vmatmul.msk.f32.vlgmr.msra.gmra.mxu3 %vm233_vm1, %v198_v22 }
 0x130   :  { %1034 = vmatmul.msk.f32.vlgmr.msra.gmra.mxu0 %vm233_vm1, %v192_v30 }
 0x131   :  { %645 = vmatpush.msrb.mxu0 %v1450_v57 }
 0x196   :  { %v429_v35 = vpop.xlane.xlu2 %428 }
 0x197   :  { %v451_v38 = vsub.f32 %v255_v23, %v429_v35 }
 0x199   :  { %v459_v43 = vmul.f32 1.442695, %v451_v38  ;;  %v1067_v38 = vpack.i.bf16 %v1450_v57, %v182_v2 }
 0x19b   :  { %1082 = vpow2.f32 %v459_v43 }
 0x19e   :  { %v432_v46 = vpop.xlane.xlu2 %431 }
 0x19f   :  { %v452_v48 = vsub.f32 %v279_v27, %v432_v46 }
 0x1a0   :  { %v327_v36 = vpop.f32.mrf.mxu3 }
 0x1a1   :  { %v436_v37 = vsel %vm426_vm2, %v327_v36, -inf  ;;  %v1440_v47 = vpop.eup %1082  ;;  %v461_v52 = vmul.f32 1.442695, %v452_v48 }
 0x1a2   :  { %v303_v39 = vpop.f32.mrf.mxu0  ;;  %437 = vmax.xlane.f32.xlu0 %v436_v37  ;;  %v475_v51 = vsel %vm426_vm2, %v1440_v47, 0.0 }
 0x1a3   :  { %v375_v40 = vpop.f32.mrf.mxu1  ;;  %v433_v41 = vsel %vm426_vm2, %v303_v39, -inf  ;;  %1084 = vpow2.f32 %v461_v52 }
 0x1a4   :  { %434 = vmax.xlane.f32.xlu1 %v433_v41  ;;  %v442_v42 = vsel %vm426_vm2, %v375_v40, -inf }
 0x1a5   :  { %443 = vmax.xlane.f32.xlu2 %v442_v42 }
 0x1a8   :  { %v399_v44 = vpop.f32.mrf.mxu3 }
 0x1a9   :  { %v445_v45 = vsel %vm426_vm2, %v399_v44, -inf  ;;  %v1446_v55 = vpop.eup %1084 }
 0x1aa   :  { %v478_v56 = vsel %vm426_vm2, %v1446_v55, 0.0 }
 0x1ac   :  { %446 = vmax.xlane.f32.xlu1 %v445_v45 }
 0x1ad   :  { %v351_v53 = vpop.f32.mrf.mxu0 }
 0x1ae   :  { %v439_v54 = vsel %vm426_vm2, %v351_v53, -inf }
 0x1b0   :  { %v423_v49 = vpop.f32.mrf.mxu3 }
 0x1b1   :  { %v448_v50 = vsel %vm426_vm2, %v423_v49, -inf }
 0x1b2   :  { %449 = vmax.xlane.f32.xlu0 %v448_v50 }
 0x1b4   :  { %476 = vadd.xlane.f32.xlu1 %v475_v51 }
 0x1ba   :  { %440 = vmax.xlane.f32.xlu0 %v439_v54 }
 0x1c2   :  { %479 = vadd.xlane.f32.xlu0 %v478_v56 }
 0x215   :  { %v438_v59 = vpop.xlane.xlu0 %437 }
 0x216   :  { %v454_v0 = vsub.f32 %v327_v36, %v438_v59 }
 0x217   :  { %v435_v58 = vpop.xlane.xlu1 %434 }
 0x218   :  { %v453_v60 = vsub.f32 %v303_v39, %v435_v58  ;;  %v444_v61 = vpop.xlane.xlu2 %443  ;;  %v465_v3 = vmul.f32 1.442695, %v454_v0 }
 0x219   :  { %v456_v62 = vsub.f32 %v375_v40, %v444_v61 }
 0x21a   :  { %v463_v63 = vmul.f32 1.442695, %v453_v60 }
 0x21b   :  { %v469_v1 = vmul.f32 1.442695, %v456_v62 }
 0x21c   :  { %1086 = vpow2.f32 %v463_v63 }
 0x21d   :  { %1088 = vpow2.f32 %v469_v1 }
 0x21e   :  { %1090 = vpow2.f32 %v465_v3 }
 0x21f   :  { %v447_v4 = vpop.xlane.xlu1 %446 }
 0x220   :  { %v457_v5 = vsub.f32 %v399_v44, %v447_v4 }
 0x222   :  { %v1453_v6 = vpop.eup %1086  ;;  %v471_v7 = vmul.f32 1.442695, %v457_v5 }
 0x223   :  { %v1455_v8 = vpop.eup %1088  ;;  %v481_v10 = vsel %vm426_vm2, %v1453_v6, 0.0 }
 0x224   :  { %1092 = vpow2.f32 %v471_v7  ;;  %482 = vadd.xlane.f32.xlu2 %v481_v10  ;;  %v490_v11 = vsel %vm426_vm2, %v1455_v8, 0.0  ;;  %v1461_v14 = vpop.eup %1090 }
 0x225   :  { %491 = vadd.xlane.f32.xlu1 %v490_v11  ;;  %v450_v12 = vpop.xlane.xlu0 %449  ;;  %v484_v17 = vsel %vm426_vm2, %v1461_v14, 0.0 }
 0x226   :  { %v458_v22 = vsub.f32 %v423_v49, %v450_v12 }
 0x227   :  { %v477_v13 = vpop.xlane.xlu1 %476 }
 0x228   :  { %1094 = vrcp.f32 %v477_v13  ;;  %v510_v25 = vand.u32 2147483648, %v477_v13  ;;  %v508_v27 = vand.u32 2147483647, %v477_v13  ;;  %v473_v28 = vmul.f32 1.442695, %v458_v22 }
 0x229   :  { %vm504_vm4 = vweird.f32 %v477_v13 }
 0x22a   :  { %v1463_v15 = vpop.eup %1092  ;;  %v511_v31 = vor.u32 1.1754944e-38, %v510_v25  ;;  %vm509_vm6 = vcmp.eq.f32.partialorder %v508_v27, 8.507059e+37 }
 0x22b   :  { %v493_v16 = vsel %vm426_vm2, %v1463_v15, 0.0 }
 0x22c   :  { %494 = vadd.xlane.f32.xlu0 %v493_v16 }
 0x22d   :  { %485 = vadd.xlane.f32.xlu1 %v484_v17  ;;  %v441_v18 = vpop.xlane.xlu0 %440 }
 0x22e   :  { %v1095_v19 = vpop.eup %1094  ;;  %v455_v20 = vsub.f32 %v351_v53, %v441_v18 }
 0x22f   :  { %v500_v21 = vmul.f32 %v1095_v19, %v477_v13  ;;  %vm505_vm3 = vweird.f32 %v1095_v19 }
 0x230   :  { %v467_v23 = vmul.f32 1.442695, %v455_v20  ;;  %vm506_vm5 = vmor %vm504_vm4, %vm505_vm3 }
 0x231   :  { %v501_v24 = vsub.f32 1.0, %v500_v21 }
 0x232   :  { %1096 = vpow2.f32 %v467_v23 }
 0x233   :  { %v502_v26 = vmul.f32 %v1095_v19, %v501_v24 }
 0x235   :  { %v503_v29 = vadd.f32 %v1095_v19, %v502_v26  ;;  %v480_v30 = vpop.xlane.xlu0 %479 }
 0x236   :  { %1098 = vrcp.f32 %v480_v30  ;;  %v525_v42 = vand.u32 2147483648, %v480_v30  ;;  %v523_v44 = vand.u32 2147483647, %v480_v30  ;;  %vm519_vm8 = vweird.f32 %v480_v30 }
 0x237   :  { %v507_v32 = vsel %vm506_vm5, %v1095_v19, %v503_v29  ;;  %1100 = vpow2.f32 %v473_v28 }
 0x238   :  { %v1469_v33 = vpop.eup %1096  ;;  %v512_v34 = vsel %vm509_vm6, %v511_v31, %v507_v32  ;;  %vm524_vm10 = vcmp.eq.f32.partialorder %v523_v44, 8.507059e+37 }
 0x239   :  { %v487_v35 = vsel %vm426_vm2, %v1469_v33, 0.0  ;;  %v513_v36 = vmul.f32 %v1440_v47, %v512_v34  ;;  %v526_v47 = vor.u32 1.1754944e-38, %v525_v42 }
 0x23a   :  { %488 = vadd.xlane.f32.xlu2 %v487_v35 }
 0x23b   :  { %619 = vst.msk [vmem:[#allocation11] sm:$0x1] %vm426_vm2, %v513_v36  ;;  %1041 = vmatmul.msk.f32.vlgmr.msrb.gmra.mxu0 %vm233_vm1, %v513_v36 }
 0x23c   :  { %v1099_v37 = vpop.eup %1098 }
 0x23d   :  { %v515_v39 = vmul.f32 %v1099_v37, %v480_v30  ;;  %v1477_v40 = vpop.eup %1100  ;;  %vm520_vm7 = vweird.f32 %v1099_v37 }
 0x23e   :  { %v496_v45 = vsel %vm426_vm2, %v1477_v40, 0.0  ;;  %vm521_vm9 = vmor %vm519_vm8, %vm520_vm7 }
 0x23f   :  { %v516_v41 = vsub.f32 1.0, %v515_v39 }
 0x240   :  { %1068 = vrot.lane.b32.xlu0 %v1067_v38, %s1280_s2 }
 0x241   :  { %v517_v43 = vmul.f32 %v1099_v37, %v516_v41 }
 0x242   :  { %497 = vadd.xlane.f32.xlu2 %v496_v45 }
 0x243   :  { %v518_v46 = vadd.f32 %v1099_v37, %v517_v43 }
 0x245   :  { %v522_v48 = vsel %vm521_vm9, %v1099_v37, %v518_v46 }
 0x246   :  { %v527_v49 = vsel %vm524_vm10, %v526_v47, %v522_v48  ;;  %1073 = vrot.lane.b32.xlu1 %v1067_v38, %s1281_s3 }
 0x247   :  { %v528_v50 = vmul.f32 %v1446_v55, %v527_v49 }
 0x249   :  { %620 = vst.msk [vmem:[#allocation11 + $0x1] sm:$0x1] %vm426_vm2, %v528_v50  ;;  %1042 = vmatmul.msk.f32.vlgmr.msra.gmra.mxu1 %vm233_vm1, %v528_v50 }
 0x25a   :  { %1078 = vrot.lane.b32.xlu2 %v1067_v38, %s1282_s1 }
 0x297   :  { %v483_v51 = vpop.xlane.xlu2 %482 }
 0x298   :  { %1102 = vrcp.f32 %v483_v51  ;;  %v492_v52 = vpop.xlane.xlu1 %491  ;;  %v540_v55 = vand.u32 2147483648, %v483_v51  ;;  %v538_v63 = vand.u32 2147483647, %v483_v51  ;;  %vm534_vm13 = vweird.f32 %v483_v51 }
 0x299   :  { %1104 = vrcp.f32 %v492_v52  ;;  %v585_v0 = vand.u32 2147483648, %v492_v52  ;;  %v583_v2 = vand.u32 2147483647, %v492_v52  ;;  %vm579_vm15 = vweird.f32 %v492_v52 }
 0x29a   :  { %v541_v5 = vor.u32 1.1754944e-38, %v540_v55  ;;  %vm539_vm3 = vcmp.eq.f32.partialorder %v538_v63, 8.507059e+37 }
 0x29b   :  { %v586_v11 = vor.u32 1.1754944e-38, %v585_v0  ;;  %vm584_vm5 = vcmp.eq.f32.partialorder %v583_v2, 8.507059e+37 }
 0x29e   :  { %v1103_v53 = vpop.eup %1102 }
 0x29f   :  { %v1105_v54 = vpop.eup %1104  ;;  %v530_v56 = vmul.f32 %v1103_v53, %v483_v51  ;;  %v495_v57 = vpop.xlane.xlu0 %494  ;;  %vm535_vm11 = vweird.f32 %v1103_v53 }
 0x2a0   :  { %v575_v58 = vmul.f32 %v1105_v54, %v492_v52  ;;  %v486_v59 = vpop.xlane.xlu1 %485  ;;  %1106 = vrcp.f32 %v495_v57  ;;  %vm580_vm12 = vweird.f32 %v1105_v54  ;;  %vm536_vm14 = vmor %vm534_vm13, %vm535_vm11  ;;  %v600_v23 = vand.u32 2147483648, %v495_v57 }
 0x2a1   :  { %v531_v60 = vsub.f32 1.0, %v530_v56  ;;  %1108 = vrcp.f32 %v486_v59  ;;  %vm581_vm4 = vmor %vm579_vm15, %vm580_vm12  ;;  %v555_v25 = vand.u32 2147483648, %v486_v59  ;;  %v598_v27 = vand.u32 2147483647, %v495_v57 }
 0x2a2   :  { %v576_v61 = vsub.f32 1.0, %v575_v58  ;;  %v553_v29 = vand.u32 2147483647, %v486_v59  ;;  %vm594_vm8 = vweird.f32 %v495_v57  ;;  %vm549_vm9 = vweird.f32 %v486_v59 }
 0x2a3   :  { %v532_v62 = vmul.f32 %v1103_v53, %v531_v60  ;;  %v556_v32 = vor.u32 1.1754944e-38, %v555_v25  ;;  %vm599_vm12 = vcmp.eq.f32.partialorder %v598_v27, 8.507059e+37  ;;  %v845_v25 = vld [vmem:[#allocation7 + $0x10] sm:$0xff]  ;;  %v843_v27 = vld [vmem:[#allocation7] sm:$0xff] }
 0x2a4   :  { %v577_v1 = vmul.f32 %v1105_v54, %v576_v61  ;;  %vm554_vm13 = vcmp.eq.f32.partialorder %v553_v29, 8.507059e+37 }
 0x2a5   :  { %v533_v3 = vadd.f32 %v1103_v53, %v532_v62 }
 0x2a6   :  { %v1107_v4 = vpop.eup %1106  ;;  %v578_v7 = vadd.f32 %v1105_v54, %v577_v1 }
 0x2a7   :  { %v1109_v10 = vpop.eup %1108  ;;  %v590_v12 = vmul.f32 %v1107_v4, %v495_v57  ;;  %v537_v13 = vsel %vm536_vm14, %v1103_v53, %v533_v3  ;;  %vm595_vm6 = vweird.f32 %v1107_v4 }
 0x2a8   :  { %v582_v16 = vsel %vm581_vm4, %v1105_v54, %v578_v7  ;;  %v545_v17 = vmul.f32 %v1109_v10, %v486_v59  ;;  %v542_v18 = vsel %vm539_vm3, %v541_v5, %v537_v13  ;;  %vm550_vm7 = vweird.f32 %v1109_v10  ;;  %vm596_vm10 = vmor %vm594_vm8, %vm595_vm6 }
 0x2a9   :  { %v587_v19 = vsel %vm584_vm5, %v586_v11, %v582_v16  ;;  %v591_v20 = vsub.f32 1.0, %v590_v12  ;;  %v543_v21 = vmul.f32 %v1453_v6, %v542_v18  ;;  %vm551_vm11 = vmor %vm549_vm9, %vm550_vm7  ;;  %vm814_vm9 = vcmask 1041409  }
 0x2aa   :  { %v546_v22 = vsub.f32 1.0, %v545_v17  ;;  %v1489_v24 = vmul.f32 %v1455_v8, %v587_v19  ;;  %v601_v8 = vor.u32 1.1754944e-38, %v600_v23 }
 0x2ab   :  { %v592_v26 = vmul.f32 %v1107_v4, %v591_v20  ;;  %621 = vst.msk [vmem:[#allocation11 + $0x2] sm:$0x1] %vm426_vm2, %v543_v21 }
 0x2ac   :  { %v547_v28 = vmul.f32 %v1109_v10, %v546_v22  ;;  %624 = vst.msk [vmem:[#allocation11 + $0x5] sm:$0x1] %vm426_vm2, %v1489_v24 }
 0x2ad   :  { %v593_v30 = vadd.f32 %v1107_v4, %v592_v26  ;;  %v489_v6 = vpop.xlane.xlu2 %488  ;;  %v844_v26 = vld [vmem:[#allocation7 + $0x8] sm:$0xff] }
 0x2ae   :  { %v548_v31 = vadd.f32 %v1109_v10, %v547_v28  ;;  %1110 = vrcp.f32 %v489_v6  ;;  %v568_v47 = vand.u32 2147483647, %v489_v6  ;;  %v570_v48 = vand.u32 2147483648, %v489_v6 }
 0x2af   :  { %v597_v34 = vsel %vm596_vm10, %v1107_v4, %v593_v30  ;;  %vm564_vm15 = vweird.f32 %v489_v6  ;;  %vm841_vm10 = vcmask 195584  }
 0x2b0   :  { %v552_v35 = vsel %vm551_vm11, %v1109_v10, %v548_v31  ;;  %v602_v36 = vsel %vm599_vm12, %v601_v8, %v597_v34  ;;  %v571_v54 = vor.u32 1.1754944e-38, %v570_v48  ;;  %vm569_vm4 = vcmp.eq.f32.partialorder %v568_v47, 8.507059e+37 }
 0x2b1   :  { %v557_v37 = vsel %vm554_vm13, %v556_v32, %v552_v35  ;;  %v603_v38 = vmul.f32 %v1463_v15, %v602_v36  ;;  %vm870_vm11 = vcmask 254976  }
 0x2b2   :  { %v1069_v39 = vpop.permute.xlu0 %1068  ;;  %v558_v41 = vmul.f32 %v1461_v14, %v557_v37 }
 0x2b3   :  { %v1070_v42 = vunpack.i.l.bf16 %v1069_v39  ;;  %v1071_v43 = vunpack.i.h.bf16 %v1069_v39  ;;  %625 = vst.msk [vmem:[#allocation11 + $0x6] sm:$0x1] %vm426_vm2, %v603_v38 }
 0x2b4   :  { %v1111_v44 = vpop.eup %1110  ;;  %622 = vst.msk [vmem:[#allocation11 + $0x3] sm:$0x1] %vm426_vm2, %v558_v41 }
 0x2b5   :  { %v560_v45 = vmul.f32 %v1111_v44, %v489_v6  ;;  %v498_v46 = vpop.xlane.xlu2 %497  ;;  %691 = vmatpush.msrb.mxu2 %v1071_v43  ;;  %714 = vmatpush.msrb.mxu3 %v1070_v42  ;;  %vm565_vm14 = vweird.f32 %v1111_v44 }
 0x2b6   :  { %1112 = vrcp.f32 %v498_v46  ;;  %1043 = vmatmul.msk.f32.vlgmr.msrb.gmra.mxu2 %vm233_vm1, %v543_v21  ;;  %1044 = vmatmul.msk.f32.vlgmr.msrb.gmra.mxu3 %vm233_vm1, %v558_v41  ;;  %vm566_vm3 = vmor %vm564_vm15, %vm565_vm14  ;;  %v615_v63 = vand.u32 2147483648, %v498_v46  ;;  %v613_v1 = vand.u32 2147483647, %v498_v46  ;;  %vm609_vm6 = vweird.f32 %v498_v46 }
 0x2b7   :  { %v561_v15 = vsub.f32 1.0, %v560_v45  ;;  %vm936_vm15 = vcmask 523264  }
 0x2b8   :  { %v1074_v14 = vpop.permute.xlu1 %1073  ;;  %v616_v3 = vor.u32 1.1754944e-38, %v615_v63  ;;  %vm614_vm8 = vcmp.eq.f32.partialorder %v613_v1, 8.507059e+37  ;;  %v647_v10 = vpop.f32.mrf.mxu0 }
 0x2b9   :  { %v562_v49 = vmul.f32 %v1111_v44, %v561_v15  ;;  %v1076_v50 = vunpack.i.h.bf16 %v1074_v14  ;;  %v1075_v51 = vunpack.i.l.bf16 %v1074_v14  ;;  %v903_v14 = vld [vmem:[#allocation8 + $0x18] sm:$0xff] }
 0x2bb   :  { %v563_v52 = vadd.f32 %v1111_v44, %v562_v49  ;;  %783 = vmatpush.msra.mxu2 %v1076_v50  ;;  %806 = vmatpush.msra.mxu3 %v1075_v51  ;;  %v902_v49 = vld [vmem:[#allocation8 + $0x10] sm:$0xff]  ;;  %v901_v50 = vld [vmem:[#allocation8 + $0x8] sm:$0xff]  ;;  %v900_v51 = vld [vmem:[#allocation8] sm:$0xff] }
 0x2bc   :  { %v1113_v53 = vpop.eup %1112 }
 0x2bd   :  { %v567_v56 = vsel %vm566_vm3, %v1111_v44, %v563_v52  ;;  %v605_v57 = vmul.f32 %v1113_v53, %v498_v46  ;;  %v1079_v58 = vpop.permute.xlu2 %1078  ;;  %vm610_vm5 = vweird.f32 %v1113_v53  ;;  %v935_v52 = vld [vmem:[%s1569_s7 + $0x38] sm:$0xff] }
 0x2be   :  { %v572_v59 = vsel %vm569_vm4, %v571_v54, %v567_v56  ;;  %v1081_v60 = vunpack.i.h.bf16 %v1079_v58  ;;  %v1080_v55 = vunpack.i.l.bf16 %v1079_v58  ;;  %1047 = vmatmul.msk.f32.vlgmr.msra.gmra.mxu2 %vm233_vm1, %v603_v38  ;;  %vm611_vm7 = vmor %vm609_vm6, %vm610_vm5  ;;  %v1285_v38 = vmov 32.0   ;;  %v933_v54 = vld [vmem:[%s1569_s7 + $0x28] sm:$0xff]  ;;  %v932_v56 = vld [vmem:[%s1569_s7 + $0x20] sm:$0xff] }
 0x2bf   :  { %v606_v61 = vsub.f32 1.0, %v605_v57  ;;  %v573_v62 = vmul.f32 %v1469_v33, %v572_v59  ;;  %1114 = vrcp.f32 %v1285_v38  ;;  %948 = vmatpush.msrb.mxu2 %v935_v52  ;;  %v931_v57 = vld [vmem:[%s1569_s7 + $0x18] sm:$0xff] }
 0x2c0   :  { %737 = vmatpush.msra.mxu0 %v1081_v60  ;;  %760 = vmatpush.msrb.mxu1 %v1080_v55  ;;  %v930_v60 = vld [vmem:[%s1569_s7 + $0x10] sm:$0xff] }
 0x2c1   :  { %v607_v0 = vmul.f32 %v1113_v53, %v606_v61  ;;  %623 = vst.msk [vmem:[#allocation11 + $0x4] sm:$0x1] %vm426_vm2, %v573_v62  ;;  %1045 = vmatmul.msk.f32.vlgmr.msra.gmra.mxu0 %vm233_vm1, %v573_v62  ;;  %1046 = vmatmul.msk.f32.vlgmr.msrb.gmra.mxu1 %vm233_vm1, %v1489_v24  ;;  %v846_v24 = vld [vmem:[#allocation7 + $0x18] sm:$0xff] }
 0x2c2   :  { %862 = vmatpush.msrb.mxu0 %v846_v24  ;;  %919 = vmatpush.msra.mxu1 %v903_v14 }
 0x2c3   :  { %v608_v2 = vadd.f32 %v1113_v53, %v607_v0 }
 0x2c4   :  { %863 = vmatpush.msrb.mxu0 %v845_v25  ;;  %920 = vmatpush.msra.mxu1 %v902_v49 }
 0x2c5   :  { %v612_v4 = vsel %vm611_vm7, %v1113_v53, %v608_v2  ;;  %v1115_v39 = vpop.eup %1114  ;;  %v934_v53 = vld [vmem:[%s1569_s7 + $0x30] sm:$0xff] }
 0x2c6   :  { %v617_v33 = vsel %vm614_vm8, %v616_v3, %v612_v4  ;;  %v670_v7 = vpop.f32.mrf.mxu1  ;;  %864 = vmatpush.msrb.mxu0 %v844_v26  ;;  %v875_v41 = vmul.f32 32.0, %v1115_v39  ;;  %921 = vmatpush.msra.mxu1 %v901_v50 }
 0x2c7   :  { %v618_v5 = vmul.f32 %v1477_v40, %v617_v33  ;;  %v813_v29 = vrot.slane %v670_v7, 7  ;;  %949 = vmatpush.msrb.mxu2 %v934_v53  ;;  %v929_v33 = vld [vmem:[%s1569_s7 + $0x8] sm:$0xff] }
 0x2c8   :  { %865 = vmatpush.msrb.mxu0 %v843_v27  ;;  %v876_v42 = vsub.f32 1.0, %v875_v41  ;;  %922 = vmatpush.msra.mxu1 %v900_v51 }
 0x2c9   :  { %626 = vst.msk [vmem:[#allocation11 + $0x7] sm:$0x1] %vm426_vm2, %v618_v5  ;;  %1048 = vmatmul.msk.f32.vlgmr.msra.gmra.mxu3 %vm233_vm1, %v618_v5  ;;  %vm839_vm2 = vcmask 130048   ;;  %v815_v6 = vsel %vm814_vm9, %v813_v29, %v647_v10  ;;  %950 = vmatpush.msrb.mxu2 %v933_v54  ;;  %v928_v5 = vld [vmem:[%s1569_s7] sm:$0xff]  ;;  %s1286_s7 = smov [#allocation11]  }
 0x2ca   :  { %v877_v43 = vmul.f32 %v1115_v39, %v876_v42  ;;  %s998_s3 = sshll.u32 %s1286_s7, 4  ;;  %s999_s3 = int_to_ptr.vmem [resolvable:$true] %s998_s3 }
 0x2cb   :  { %951 = vmatpush.msrb.mxu2 %v932_v56  ;;  %1006 = dma.vmem_to_hbm [thread:$0]  %s999_s3, 128, %s1001_s24, [#allocation12], %s1283_s4, %s1283_s4, %s1287_s25  }
 0x2cc   :  { %v878_v44 = vadd.f32 %v1115_v39, %v877_v43 }
 0x2cd   :  { %952 = vmatpush.msrb.mxu2 %v931_v57 }
 0x2cf   :  { %953 = vmatpush.msrb.mxu2 %v930_v60 }
 0x2d1   :  { %954 = vmatpush.msrb.mxu2 %v929_v33 }
 0x2d3   :  { %955 = vmatpush.msrb.mxu2 %v928_v5 }
 0x339   :  { %v716_v11 = vpop.f32.mrf.mxu3  ;;  %v693_v13 = vpop.f32.mrf.mxu2 }
 0x33a   :  { %v819_v12 = vrot.slane %v716_v11, 7 }
 0x33c   :  { %v820_v16 = vsel %vm814_vm9, %v819_v12, %v693_v13 }
 0x33d   :  { %821 = vrot.lane.b32.xlu0 %v820_v16, %s1276_s18 }
 0x33e   :  { %v762_v17 = vpop.f32.mrf.mxu1  ;;  %v739_v19 = vpop.f32.mrf.mxu0 }
 0x33f   :  { %v826_v18 = vrot.slane %v762_v17, 7 }
 0x341   :  { %v827_v20 = vsel %vm814_vm9, %v826_v18, %v739_v19  ;;  %v785_v22 = vpop.f32.mrf.mxu2 }
 0x342   :  { %828 = vrot.lane.b32.xlu1 %v827_v20, %s1283_s4 }
 0x34c   :  { %v808_v40 = vpop.f32.mrf.mxu3 }
 0x34d   :  { %v833_v21 = vrot.slane %v808_v40, 7 }
 0x34f   :  { %v834_v23 = vsel %vm814_vm9, %v833_v21, %v785_v22 }
 0x350   :  { %835 = vrot.lane.b32.xlu0 %v834_v23, %s1284_s29 }
 0x3af   :  { %v822_v28 = vpop.permute.xlu0 %821 }
 0x3b0   :  { %v838_v31 = vsel %vm233_vm1, %v815_v6, %v822_v28  ;;  %vm879_vm1 = vweird.f32 %v1115_v39 }
 0x3b1   :  { %v1519_v45 = vsel %vm879_vm1, %v1115_v39, %v878_v44 }
 0x3b4   :  { %v829_v30 = vpop.permute.xlu1 %828 }
 0x3b5   :  { %v840_v8 = vsel %vm839_vm2, %v838_v31, %v829_v30 }
 0x3c2   :  { %v836_v32 = vpop.permute.xlu0 %835 }
 0x3c3   :  { %v842_v34 = vsel %vm841_vm10, %v840_v8, %v836_v32 }
 0x3c4   :  { %1049 = vmatmul.msk.f32.vlgmr.msrb.gmra.mxu0 %vm101_vm0, %v842_v34 }
 0x441   :  { %v867_v35 = vpop.f32.mrf.mxu0 }
 0x442   :  { %v868_v36 = vadd.f32 %v867_v35, %v1380_v9 }
 0x444   :  { %v871_v37 = vsel %vm870_vm11, %v868_v36, 0.0 }
 0x445   :  { %872 = vadd.xlane.f32.xlu2 %v871_v37 }
 0x4b8   :  { %v873_v46 = vpop.xlane.xlu2 %872 }
 0x4b9   :  { %v881_v15 = vmul.f32 %v1519_v45, %v873_v46 }
 0x4bb   :  { %v882_v47 = vsub.f32 %v868_v36, %v881_v15 }
 0x4bd   :  { %v883_v48 = vmul.f32 %v882_v47, %v882_v47 }
 0x4bf   :  { %v884_v9 = vsel %vm870_vm11, %v883_v48, 0.0 }
 0x4c0   :  { %885 = vadd.xlane.f32.xlu1 %v884_v9 }
 0x533   :  { %v886_v58 = vpop.xlane.xlu1 %885 }
 0x534   :  { %v887_v59 = vmul.f32 %v886_v58, %v1519_v45 }
 0x536   :  { %v888_v55 = vadd.f32 1e-05, %v887_v59 }
 0x538   :  { %1116 = vrsqrt.f32 %v888_v55  ;;  %vm895_vm13 = vweird.f32 %v888_v55 }
 0x53e   :  { %v1117_v61 = vpop.eup %1116 }
 0x53f   :  { %v890_v62 = vmul.f32 %v1117_v61, %v888_v55  ;;  %vm896_vm12 = vweird.f32 %v1117_v61 }
 0x540   :  { %vm897_vm14 = vmor %vm895_vm13, %vm896_vm12 }
 0x541   :  { %v891_v63 = vmul.f32 %v1117_v61, %v890_v62 }
 0x543   :  { %v892_v0 = vmul.f32 0.5, %v891_v63 }
 0x545   :  { %v893_v1 = vsub.f32 1.5, %v892_v0 }
 0x547   :  { %v894_v2 = vmul.f32 %v1117_v61, %v893_v1 }
 0x549   :  { %v898_v3 = vsel %vm897_vm14, %v1117_v61, %v894_v2 }
 0x54a   :  { %v899_v4 = vmul.f32 %v898_v3, %v882_v47 }
 0x54c   :  { %1050 = vmatmul.msk.f32.vlgmr.msra.gmra.mxu1 %vm101_vm0, %v899_v4 }
 0x5c9   :  { %v924_v7 = vpop.f32.mrf.mxu1 }
 0x5ca   :  { %v927_v10 = vmax.f32 %v924_v7, 0.0 }
 0x5cc   :  { %1051 = vmatmul.msk.f32.vlgmr.msrb.gmra.mxu2 %vm936_vm15, %v927_v10 }
 0x64f   :  { %v957_v11 = vpop.f32.mrf.mxu2 }
 0x650   :  { %v958_v12 = vadd.f32 %v957_v11, %v899_v4 }
 0x652   :  { %v960_v13 = vsel %vm870_vm11, %v958_v12, 0.0 }
 0x653   :  { %961 = vadd.xlane.f32.xlu0 %v960_v13 }
 0x6c6   :  { %v962_v16 = vpop.xlane.xlu0 %961 }
 0x6c7   :  { %v963_v17 = vmul.f32 %v962_v16, %v1519_v45 }
 0x6c9   :  { %v964_v18 = vsub.f32 %v958_v12, %v963_v17 }
 0x6cb   :  { %v965_v19 = vmul.f32 %v964_v18, %v964_v18 }
 0x6cd   :  { %v966_v20 = vsel %vm870_vm11, %v965_v19, 0.0 }
 0x6ce   :  { %967 = vadd.xlane.f32.xlu2 %v966_v20 }
 0x741   :  { %v968_v40 = vpop.xlane.xlu2 %967 }
 0x742   :  { %v969_v21 = vmul.f32 %v968_v40, %v1519_v45 }
 0x744   :  { %v970_v22 = vadd.f32 1e-05, %v969_v21 }
 0x746   :  { %1118 = vrsqrt.f32 %v970_v22  ;;  %vm977_vm3 = vweird.f32 %v970_v22 }
 0x74c   :  { %v1119_v23 = vpop.eup %1118 }
 0x74d   :  { %v972_v24 = vmul.f32 %v1119_v23, %v970_v22  ;;  %vm978_vm0 = vweird.f32 %v1119_v23 }
 0x74e   :  { %vm979_vm4 = vmor %vm977_vm3, %vm978_vm0 }
 0x74f   :  { %v973_v25 = vmul.f32 %v1119_v23, %v972_v24 }
 0x751   :  { %v974_v26 = vmul.f32 0.5, %v973_v25 }
 0x753   :  { %v975_v27 = vsub.f32 1.5, %v974_v26 }
 0x755   :  { %v976_v28 = vmul.f32 %v1119_v23, %v975_v27 }
 0x757   :  { %v980_v29 = vsel %vm979_vm4, %v1119_v23, %v976_v28 }
 0x758   :  { %v981_v30 = vmul.f32 %v980_v29, %v964_v18 }
 0x75a   :  { %982 = vst.msk [vmem:[#allocation10] sm:$0x3] %vm870_vm11, %v981_v30 }
 0x75b   :  { %993 = dma.vmem_to_hbm [thread:$0]  %s989_s26, 32, %s991_s28, [#allocation4]  }
 0x75c   :  { %1270 = dma.done.wait [#allocation4], 32  }
 0x75d   :  { %1271 = vsyncadd [#allocation4], 4294967264 }
 0x75e   :  { %1272 = dma.done.wait [#allocation12], 128  }
 0x75f   :  { %1273 = vsyncadd [#allocation12], 4294967168 }
 0x760   :  { %1015 = vsyncpa [#allocation3], 1 }
 0x761   :  { %1016 = vsyncpa [#allocation6], 1 }
 0x762   :  { %1017 = vsyncpa [#allocation9], 1 }
 0x763   :  { %1018 = vsyncpa [#allocation4], 1 }
 0x764   :  { %1019 = vsyncpa [#allocation12], 1 }

</bundles_post_ra>
